<compile_context>
chip_gen: v7x
topology: tpu7x:2x2x1
jax: 0.10.0
libtpu: 0.0.40
codegen_flags: <defaults>
</compile_context>

<pallas_src>
import functools

import jax
import jax.numpy as jnp
from jax import lax
from jax.experimental import pallas as pl
from jax.experimental.pallas import tpu as pltpu

LN_EPS = 1e-5


def _round_up(n: int, m: int) -> int:
    return ((n + m - 1) // m) * m


def _vmem_capacity_bytes() -> int:
    """Per-core physical VMEM (v5e/v6e: 128 MiB, v7x: 64 MiB)."""
    try:
        return int(pltpu.get_tpu_info().vmem_capacity_bytes)
    except Exception:
        return 64 << 20  # conservative fallback (v7x per-TC)


def _block_spec(shape, index_map, *, single_buffer=False):
    """BlockSpec; invariant operands get a single pipeline buffer."""
    if single_buffer and hasattr(pl, "Buffered"):
        try:
            return pl.BlockSpec(shape, index_map, pipeline_mode=pl.Buffered(1))
        except TypeError:
            pass  # older jax: fall back to default buffering
    return pl.BlockSpec(shape, index_map)


def _ffl_kernel(x_ref, w_ref, b_ref, g_ref, be_ref, alpha_ref, o_ref, acc_ref,
                *, d_out, n_pad):
    """grid = (batch_tiles, k_tiles). Linear accumulates over k; LN/PReLU at last k."""
    k = pl.program_id(1)

    @pl.when(k == 0)
    def _init():
        acc_ref[...] = jnp.zeros_like(acc_ref)

    # Plain (TB, TK) @ (TK, D_pad) MXU matmul, f32 accumulation.
    acc_ref[...] += jnp.dot(x_ref[...], w_ref[...],
                            preferred_element_type=jnp.float32)

    @pl.when(k == pl.num_programs(1) - 1)
    def _finalize():
        y = acc_ref[...] + b_ref[...]            # pad columns stay exactly 0
        inv_n = 1.0 / d_out
        mean = jnp.sum(y, axis=-1, keepdims=True) * inv_n   # zeros: exact sum
        centered = y - mean
        ssq = jnp.sum(centered * centered, axis=-1, keepdims=True)
        if n_pad:  # static: pad cols contribute exactly n_pad * mean^2
            ssq = ssq - (float(n_pad) * (mean * mean))
        inv_std = lax.rsqrt(ssq * inv_n + LN_EPS)
        z = centered * (inv_std * g_ref[...]) + be_ref[...]
        alpha = alpha_ref[0, 0]                  # PReLU scalar (torch default)
        o_ref[...] = jnp.where(z >= 0.0, z, alpha * z).astype(o_ref.dtype)


@functools.partial(jax.jit,
                   static_argnames=("batch_tile", "k_tile", "use_bf16_matmul"))
def feed_forward_linear_block(x, weight, bias, gamma, beta, alpha, *,
                              batch_tile=None, k_tile=None,
                              use_bf16_matmul=False):
    """x: (B, D_in); weight: (D_out, D_in) torch layout; returns (B, D_out)."""
    B, D_in = x.shape
    D_out = weight.shape[0]
    out_dtype = x.dtype

    # MXU operand dtype: follow the input dtype, or force bf16 when requested.
    mm_dtype = (jnp.bfloat16
                if (use_bf16_matmul or x.dtype == jnp.bfloat16)
                else jnp.float32)
    mm_size = jnp.dtype(mm_dtype).itemsize
    out_size = jnp.dtype(out_dtype).itemsize

    cap = _vmem_capacity_bytes()
    budget = cap - (8 << 20)                     # headroom below physical VMEM

    # ---- Lane-dense output: pad D_out to a multiple of 128 (zeros).
    D_pad = _round_up(D_out, 128)
    n_pad_cols = D_pad - D_out

    # ---- K (D_in) tiling: only when the single-buffered resident weight
    # would blow the VMEM budget (e.g. large D on v7x's 64 MiB).
    if k_tile is not None:
        TK = int(k_tile)
    elif D_in * D_pad * mm_size > budget // 2:
        TK = 512
        while TK > 128 and 2 * TK * D_pad * mm_size > budget // 2:
            TK //= 2
    else:
        TK = D_in                                # whole D_in in one step
    D_in_pad = D_in if TK == D_in else _round_up(D_in, TK)
    kt = D_in_pad // TK
    w_bufs = 1 if kt == 1 else 2                 # invariant W -> single buffer

    # ---- Batch tile from the remaining VMEM budget.
    fixed = (w_bufs * TK * D_pad * mm_size       # weight block(s)
             + 3 * D_pad * 4                     # bias / gamma / beta rows
             + (2 << 20))                        # misc slack

    def _tile_bytes(tb):
        return (2 * tb * TK * mm_size            # x tile (double-buffered)
                + 2 * tb * D_pad * out_size      # out tile (double-buffered)
                + tb * D_pad * 4                 # f32 accumulator scratch
                + 3 * tb * D_pad * 4)            # y / centered / z temporaries

    if batch_tile is not None:
        TB = int(batch_tile)
    else:
        TB = 512
        while TB > 8 and fixed + _tile_bytes(TB) > budget:
            TB //= 2
        TB = max(TB, 8)
        if B <= TB:
            # >= 2 batch tiles for B >= 16 so both v7x TensorCores get work.
            TB = _round_up((B + 1) // 2, 8) if B >= 16 else _round_up(max(B, 1), 8)
        else:
            # Shrink tile when batch-padding waste would exceed half a tile.
            while TB > 8 and _round_up(B, TB) - B > TB // 2:
                TB //= 2
    B_pad = _round_up(B, TB)

    # ---- Operand prep (fuses under jit; weight.T happens once, not per step).
    x_p = jnp.pad(x.astype(mm_dtype), ((0, B_pad - B), (0, D_in_pad - D_in)))
    w_t = jnp.pad(weight.T.astype(mm_dtype),
                  ((0, D_in_pad - D_in), (0, n_pad_cols)))
    b_row = jnp.pad(bias.astype(jnp.float32).reshape(1, D_out),
                    ((0, 0), (0, n_pad_cols)))
    g_row = jnp.pad(gamma.astype(jnp.float32).reshape(1, D_out),
                    ((0, 0), (0, n_pad_cols)))
    be_row = jnp.pad(beta.astype(jnp.float32).reshape(1, D_out),
                     ((0, 0), (0, n_pad_cols)))
    a_scalar = jnp.asarray(alpha, jnp.float32).reshape(1, 1)

    grid = (B_pad // TB, kt)

    # Always pass an explicit limit (v5e default is 16 MiB), capped below the
    # physical per-core capacity (v7x: 64 MiB).
    vmem_limit = int(min(max(fixed + _tile_bytes(TB), 32 << 20),
                         cap - (4 << 20)))

    kernel = functools.partial(_ffl_kernel, d_out=float(D_out),
                               n_pad=n_pad_cols)

    out = pl.pallas_call(
        kernel,
        out_shape=jax.ShapeDtypeStruct((B_pad, D_pad), out_dtype),
        grid_spec=pltpu.PrefetchScalarGridSpec(
            num_scalar_prefetch=0,
            grid=grid,
            in_specs=[
                pl.BlockSpec((TB, TK), lambda i, k: (i, k)),        # x: tiled
                _block_spec((TK, D_pad), lambda i, k: (k, 0),
                            single_buffer=(kt == 1)),               # weight
                _block_spec((1, D_pad), lambda i, k: (0, 0),
                            single_buffer=True),                    # bias
                _block_spec((1, D_pad), lambda i, k: (0, 0),
                            single_buffer=True),                    # gamma
                _block_spec((1, D_pad), lambda i, k: (0, 0),
                            single_buffer=True),                    # beta
                pl.BlockSpec((1, 1), lambda i, k: (0, 0),
                             memory_space=pltpu.SMEM),              # PReLU alpha
            ],
            out_specs=pl.BlockSpec((TB, D_pad), lambda i, k: (i, 0)),
            scratch_shapes=[pltpu.VMEM((TB, D_pad), jnp.float32)],
        ),
        compiler_params=pltpu.CompilerParams(
            dimension_semantics=("parallel", "arbitrary"),
            vmem_limit_bytes=vmem_limit,
        ),
    )(x_p, w_t, b_row, g_row, be_row, a_scalar)

    return out[:B, :D_out]


def reference(x, weight, bias, gamma, beta, alpha):
    """Pure-JAX reference matching torch semantics."""
    y = x @ weight.T + bias
    mean = jnp.mean(y, axis=-1, keepdims=True)
    var = jnp.mean((y - mean) ** 2, axis=-1, keepdims=True)
    z = (y - mean) / jnp.sqrt(var + LN_EPS) * gamma + beta
    return jnp.where(z >= 0, z, alpha * z)


if __name__ == "__main__":
    key = jax.random.PRNGKey(0)
    k_x, k_w, k_b, k_x2, k_w2, k_b2 = jax.random.split(key, 6)

    # ---- Case 1: D_in=32, D_out=64 (D_out padded to 128 inside the kernel).
    B, D_in, D_out = 12, 32, 64
    x = jax.random.normal(k_x, (B, D_in), jnp.float32)
    bound = 1.0 / (D_in ** 0.5)
    weight = jax.random.uniform(k_w, (D_out, D_in), jnp.float32, -bound, bound)
    bias = jax.random.uniform(k_b, (D_out,), jnp.float32, -bound, bound)
    gamma = jnp.ones((D_out,), jnp.float32)   # LayerNorm weight init
    beta = jnp.zeros((D_out,), jnp.float32)   # LayerNorm bias init
    alpha = jnp.float32(0.25)                 # PReLU default init

    ref = reference(x, weight, bias, gamma, beta, alpha)

    out = jax.block_until_ready(
        feed_forward_linear_block(x, weight, bias, gamma, beta, alpha))
    assert out.shape == (B, D_out)
    assert jnp.allclose(out, ref, atol=3e-5, rtol=3e-5), "mismatch (default)"

    # Multi-step batch grid + batch padding path.
    out2 = jax.block_until_ready(
        feed_forward_linear_block(x, weight, bias, gamma, beta, alpha,
                                  batch_tile=8))
    assert out2.shape == (B, D_out)
    assert jnp.allclose(out2, ref, atol=3e-5, rtol=3e-5), "mismatch (batch-tiled)"

    # bf16 MXU operands (f32 accumulation / LN): looser tolerance.
    out3 = jax.block_until_ready(
        feed_forward_linear_block(x, weight, bias, gamma, beta, alpha,
                                  use_bf16_matmul=True))
    assert jnp.allclose(out3, ref, atol=5e-2, rtol=5e-2), "mismatch (bf16 matmul)"

    # ---- Case 2: D_in=160 with k_tile=128 -> exercises the K-reduction grid
    # axis (kt=2), the accumulator scratch, and D_in zero-padding.
    D_in2 = 160
    x2 = jax.random.normal(k_x2, (B, D_in2), jnp.float32)
    bound2 = 1.0 / (D_in2 ** 0.5)
    weight2 = jax.random.uniform(k_w2, (D_out, D_in2), jnp.float32,
                                 -bound2, bound2)
    bias2 = jax.random.uniform(k_b2, (D_out,), jnp.float32, -bound2, bound2)
    ref2 = reference(x2, weight2, bias2, gamma, beta, alpha)

    out4 = jax.block_until_ready(
        feed_forward_linear_block(x2, weight2, bias2, gamma, beta, alpha,
                                  k_tile=128))
    assert out4.shape == (B, D_out)
    assert jnp.allclose(out4, ref2, atol=3e-5, rtol=3e-5), "mismatch (k-tiled)"

    print("KERNEL_OK")
</pallas_src>

<mosaic_0001>
module attributes {stable_mosaic.version = 11 : i64} {
  func.func @_ffl_kernel(%arg0: i32, %arg1: i32, %arg2: memref<16x32xf32, #tpu.memory_space<vmem>>, %arg3: memref<32x128xf32, #tpu.memory_space<vmem>>, %arg4: memref<1x128xf32, #tpu.memory_space<vmem>>, %arg5: memref<1x128xf32, #tpu.memory_space<vmem>>, %arg6: memref<1x128xf32, #tpu.memory_space<vmem>>, %arg7: memref<1x1xf32, #tpu.memory_space<smem>>, %arg8: memref<16x128xf32, #tpu.memory_space<vmem>>, %arg9: memref<16x128xf32, #tpu.memory_space<vmem>>) attributes {dimension_semantics = [#tpu.dimension_semantics<parallel>, #tpu.dimension_semantics<arbitrary>], iteration_bounds = array<i64: 1, 1>, scalar_prefetch = 0 : i64, scratch_operands = 1 : i64, tpu.core_type = #tpu.core_type<tc>, window_params = [{transform_indices = @transform_0, window_bounds = array<i64: 16, 32>}, {pipeline_mode = #tpu.pipeline_mode<synchronous>, transform_indices = @transform_1, window_bounds = array<i64: 32, 128>}, {pipeline_mode = #tpu.pipeline_mode<synchronous>, transform_indices = @transform_2, window_bounds = array<i64: 1, 128>}, {pipeline_mode = #tpu.pipeline_mode<synchronous>, transform_indices = @transform_3, window_bounds = array<i64: 1, 128>}, {pipeline_mode = #tpu.pipeline_mode<synchronous>, transform_indices = @transform_4, window_bounds = array<i64: 1, 128>}, {transform_indices = @transform_5, window_bounds = array<i64: 1, 1>}, {transform_indices = @transform_6, window_bounds = array<i64: 16, 128>}]} {
    %c0_i32 = arith.constant 0 : i32
    %0 = arith.cmpi eq, %arg1, %c0_i32 : i32
    %1 = arith.extui %0 : i1 to i32
    %c0_i32_0 = arith.constant 0 : i32
    %2 = arith.cmpi ne, %1, %c0_i32_0 : i32
    scf.if %2 {
      %cst_10 = arith.constant 0.000000e+00 : f32
      %12 = vector.broadcast %cst_10 : f32 to vector<16x128xf32>
      %c0_11 = arith.constant 0 : index
      %c0_12 = arith.constant 0 : index
      %13 = vector.load %arg9[%c0_11, %c0_12] : memref<16x128xf32, #tpu.memory_space<vmem>>, vector<16x128xf32>
      tpu.vector_store %arg9[%c0_11, %c0_12], %12 {strides = array<i32>} : memref<16x128xf32, #tpu.memory_space<vmem>>, vector<16x128xf32>,
    } else {
    }
    %c0 = arith.constant 0 : index
    %c0_1 = arith.constant 0 : index
    %3 = vector.load %arg9[%c0, %c0_1] : memref<16x128xf32, #tpu.memory_space<vmem>>, vector<16x128xf32>
    %c0_2 = arith.constant 0 : index
    %c0_3 = arith.constant 0 : index
    %4 = vector.load %arg2[%c0_2, %c0_3] : memref<16x32xf32, #tpu.memory_space<vmem>>, vector<16x32xf32>
    %c0_4 = arith.constant 0 : index
    %c0_5 = arith.constant 0 : index
    %5 = vector.load %arg3[%c0_4, %c0_5] : memref<32x128xf32, #tpu.memory_space<vmem>>, vector<32x128xf32>
    %cst = arith.constant dense<0.000000e+00> : vector<16x128xf32>
    %6 = tpu.matmul %4, %5, %cst {dimension_numbers = #tpu.dot_dimension_numbers<[1], [0], [0], [1], [0, 0, 1, 1], [], []>} : vector<16x32xf32>, vector<32x128xf32>, vector<16x128xf32> -> vector<16x128xf32>
    %7 = arith.addf %3, %6 : vector<16x128xf32>
    %c0_6 = arith.constant 0 : index
    %c0_7 = arith.constant 0 : index
    %8 = vector.load %arg9[%c0_6, %c0_7] : memref<16x128xf32, #tpu.memory_space<vmem>>, vector<16x128xf32>
    tpu.vector_store %arg9[%c0_6, %c0_7], %7 {strides = array<i32>} : memref<16x128xf32, #tpu.memory_space<vmem>>, vector<16x128xf32>,
    %c0_i32_8 = arith.constant 0 : i32
    %9 = arith.cmpi eq, %arg1, %c0_i32_8 : i32
    %10 = arith.extui %9 : i1 to i32
    %c0_i32_9 = arith.constant 0 : i32
    %11 = arith.cmpi ne, %10, %c0_i32_9 : i32
    scf.if %11 {
      %c0_10 = arith.constant 0 : index
      %c0_11 = arith.constant 0 : index
      %12 = vector.load %arg9[%c0_10, %c0_11] : memref<16x128xf32, #tpu.memory_space<vmem>>, vector<16x128xf32>
      %c0_12 = arith.constant 0 : index
      %c0_13 = arith.constant 0 : index
      %13 = vector.load %arg4[%c0_12, %c0_13] : memref<1x128xf32, #tpu.memory_space<vmem>>, vector<1x128xf32>
      %14 = vector.broadcast %13 : vector<1x128xf32> to vector<16x128xf32>
      %15 = arith.addf %12, %14 : vector<16x128xf32>
      %cst_14 = arith.constant dense<0.000000e+00> : vector<16xf32>
      %16 = vector.multi_reduction <add>, %15, %cst_14 [1] : vector<16x128xf32> to vector<16xf32>
      %17 = vector.shape_cast %16 : vector<16xf32> to vector<16x1xf32>
      %cst_15 = arith.constant 1.562500e-02 : f32
      %18 = vector.broadcast %cst_15 : f32 to vector<16x1xf32>
      %19 = arith.mulf %17, %18 : vector<16x1xf32>
      %20 = vector.broadcast %19 : vector<16x1xf32> to vector<16x128xf32>
      %21 = arith.subf %15, %20 : vector<16x128xf32>
      %22 = arith.mulf %21, %21 : vector<16x128xf32>
      %cst_16 = arith.constant dense<0.000000e+00> : vector<16xf32>
      %23 = vector.multi_reduction <add>, %22, %cst_16 [1] : vector<16x128xf32> to vector<16xf32>
      %24 = vector.shape_cast %23 : vector<16xf32> to vector<16x1xf32>
      %25 = arith.mulf %19, %19 : vector<16x1xf32>
      %cst_17 = arith.constant 6.400000e+01 : f32
      %26 = vector.broadcast %cst_17 : f32 to vector<16x1xf32>
      %27 = arith.mulf %26, %25 : vector<16x1xf32>
      %28 = arith.subf %24, %27 : vector<16x1xf32>
      %cst_18 = arith.constant 1.562500e-02 : f32
      %29 = vector.broadcast %cst_18 : f32 to vector<16x1xf32>
      %30 = arith.mulf %28, %29 : vector<16x1xf32>
      %cst_19 = arith.constant 9.99999974E-6 : f32
      %31 = vector.broadcast %cst_19 : f32 to vector<16x1xf32>
      %32 = arith.addf %30, %31 : vector<16x1xf32>
      %33 = math.rsqrt %32 : vector<16x1xf32>
      %c0_20 = arith.constant 0 : index
      %c0_21 = arith.constant 0 : index
      %34 = vector.load %arg5[%c0_20, %c0_21] : memref<1x128xf32, #tpu.memory_space<vmem>>, vector<1x128xf32>
      %35 = vector.broadcast %33 : vector<16x1xf32> to vector<16x128xf32>
      %36 = vector.broadcast %34 : vector<1x128xf32> to vector<16x128xf32>
      %37 = arith.mulf %35, %36 : vector<16x128xf32>
      %38 = arith.mulf %21, %37 : vector<16x128xf32>
      %c0_22 = arith.constant 0 : index
      %c0_23 = arith.constant 0 : index
      %39 = vector.load %arg6[%c0_22, %c0_23] : memref<1x128xf32, #tpu.memory_space<vmem>>, vector<1x128xf32>
      %40 = vector.broadcast %39 : vector<1x128xf32> to vector<16x128xf32>
      %41 = arith.addf %38, %40 : vector<16x128xf32>
      %c0_24 = arith.constant 0 : index
      %c0_25 = arith.constant 0 : index
      %42 = memref.load %arg7[%c0_24, %c0_25] : memref<1x1xf32, #tpu.memory_space<smem>>
      %cst_26 = arith.constant 0.000000e+00 : f32
      %43 = vector.broadcast %cst_26 : f32 to vector<16x128xf32>
      %44 = arith.cmpf oge, %41, %43 : vector<16x128xf32>
      %45 = vector.broadcast %42 : f32 to vector<16x128xf32>
      %46 = arith.mulf %45, %41 : vector<16x128xf32>
      %47 = arith.select %44, %41, %46 : vector<16x128xi1>, vector<16x128xf32>
      %c0_27 = arith.constant 0 : index
      %c0_28 = arith.constant 0 : index
      %48 = vector.load %arg8[%c0_27, %c0_28] : memref<16x128xf32, #tpu.memory_space<vmem>>, vector<16x128xf32>
      tpu.vector_store %arg8[%c0_27, %c0_28], %47 {strides = array<i32>} : memref<16x128xf32, #tpu.memory_space<vmem>>, vector<16x128xf32>,
    } else {
    }
    return
  }
  func.func @transform_0(%arg0: i32, %arg1: i32) -> (i32, i32) {
    %c0_i32 = arith.constant 0 : i32
    return %arg0, %arg1 : i32, i32
  }
  func.func @transform_1(%arg0: i32, %arg1: i32) -> (i32, i32) {
    %c0_i32 = arith.constant 0 : i32
    %c0_i32_0 = arith.constant 0 : i32
    return %arg1, %c0_i32 : i32, i32
  }
  func.func @transform_2(%arg0: i32, %arg1: i32) -> (i32, i32) {
    %c0_i32 = arith.constant 0 : i32
    %c0_i32_0 = arith.constant 0 : i32
    %c0_i32_1 = arith.constant 0 : i32
    return %c0_i32, %c0_i32_0 : i32, i32
  }
  func.func @transform_3(%arg0: i32, %arg1: i32) -> (i32, i32) {
    %c0_i32 = arith.constant 0 : i32
    %c0_i32_0 = arith.constant 0 : i32
    %c0_i32_1 = arith.constant 0 : i32
    return %c0_i32, %c0_i32_0 : i32, i32
  }
  func.func @transform_4(%arg0: i32, %arg1: i32) -> (i32, i32) {
    %c0_i32 = arith.constant 0 : i32
    %c0_i32_0 = arith.constant 0 : i32
    %c0_i32_1 = arith.constant 0 : i32
    return %c0_i32, %c0_i32_0 : i32, i32
  }
  func.func @transform_5(%arg0: i32, %arg1: i32) -> (i32, i32) {
    %c0_i32 = arith.constant 0 : i32
    %c0_i32_0 = arith.constant 0 : i32
    %c0_i32_1 = arith.constant 0 : i32
    return %c0_i32, %c0_i32_0 : i32, i32
  }
  func.func @transform_6(%arg0: i32, %arg1: i32) -> (i32, i32) {
    %c0_i32 = arith.constant 0 : i32
    %c0_i32_0 = arith.constant 0 : i32
    return %arg0, %c0_i32 : i32, i32
  }
}

</mosaic_0001>

<bundles_post_ra>
// kernel: feed_forward_linear_block.1
= control target key start
LH: loop header
LB: loop body
LE: loop exit
PB: predicated region body
PF: predicated region fallthrough
CT: control target
= control target key end

     0   :  { %vm39_vm0 = vcmask 261120   ;;  %s352_s0 = inlined_call_operand.vmem [shape: f32[16,32], index: 0, kind: input, shape index: {}]   ;;  %s353_s1 = inlined_call_operand.vmem [shape: f32[32,128], index: 1, kind: input, shape index: {}]   ;;  %s354_s2 = inlined_call_operand.vmem [shape: f32[1,128], index: 2, kind: input, shape index: {}]   ;;  %s355_s3 = inlined_call_operand.vmem [shape: f32[1,128], index: 3, kind: input, shape index: {}]   ;;  %s356_s4 = inlined_call_operand.vmem [shape: f32[1,128], index: 4, kind: input, shape index: {}]   ;;  %s357_s5 = inlined_call_operand.<no memory space> [shape: f32[1,1], index: 5, kind: input, shape index: {}]   ;;  %s358_s6 = inlined_call_operand.hbm [shape: f32[16,128], index: 6, kind: output, shape index: {}]  }
   0x1   :  { %v35_v0 = vld [vmem:[%s353_s1] sm:$0xff]  ;;  %v36_v1 = vld [vmem:[%s353_s1 + $0x8] sm:$0xff]  ;;  %v37_v2 = vld [vmem:[%s353_s1 + $0x10] sm:$0xff] }
   0x2   :  { %v233_v3 = vpack.c.bf16 %v36_v1, %v35_v0  ;;  %v38_v4 = vld [vmem:[%s353_s1 + $0x18] sm:$0xff]  ;;  %v33_v5 = vld [vmem:[%s352_s0] sm:$0xff] }
   0x3   :  { %v237_v6 = vpack.c.bf16 %v38_v4, %v37_v2  ;;  %230 = vmatprep.mubr.msk.f32.mxu0 %vm39_vm0, %v33_v5 }
   0x4   :  { %12 = vsyncpa [#allocation5], 0  ;;  %234 = vmatprep.subr.bf16.mxu0 %v233_v3  ;;  %v34_v7 = vld [vmem:[%s352_s0 + $0x8] sm:$0xff]  ;;  %v213_v8 = vld [vmem:[%s354_s2] ss:$0 sm:$0xff]  ;;  %v188_v39 = vstv %s357_s5  ;;  %s272_s14 = smov [#allocation4]  }
   0x5   :  { %236 = vmatpush3.bf16.msra.mxu0 %v233_v3  ;;  %v214_v33 = vld [vmem:[%s355_s3] ss:$0 sm:$0xff]  ;;  %s200_s15 = sshll.u32 %s272_s14, 4  ;;  %s201_s15 = int_to_ptr.vmem [resolvable:$true] %s200_s15 }
   0x6   :  { %238 = vmatprep.subr.bf16.mxu0 %v237_v6  ;;  %v215_v36 = vld [vmem:[%s356_s4] ss:$0 sm:$0xff]  ;;  %s248_s3 = scalar_lea.vmem %s201_s15, 256  ;;  %p253_p1 = scmp.lt.s32.totalorder %s201_s15, %s201_s15 }
   0x7   :  { %p249_p0 = scmp.ne.s32.totalorder %s201_s15, %s248_s3  ;;  %p254_p2 = scmp.lt.s32.totalorder %s248_s3, %s248_s3 }
   0x9   :  { %240 = vmatpush3.bf16.msra.mxu0 %v237_v6  ;;  %p255_p3 = por %p254_p2, %p253_p1 }
   0xb   :  { %p256_p4 = pnand %p255_p3, %p249_p0 }
   0xc   :  { %231 = vmatmul.mubr.msk.f32.vlgmr.msra.gmra.mrb[0].mxu0 %vm39_vm0, %v34_v7 }
  0xdf   :  { %v232_v9 = vpop.f32.mrb[0].mxu0 }
  0xe0   :  { %v112_v10 = vpop.f32.mrb[1].mxu0  ;;  %v138_v12 = vadd.f32 %v232_v9, %v213_v8 }
  0xe1   :  { %v137_v11 = vadd.f32 %v213_v8, %v112_v10 }
  0xe3   :  { %139 = vadd.xlane.f32.xlu0 %v137_v11 }
  0xe7   :  { %141 = vadd.xlane.f32.xlu0 %v138_v12 }
 0x170   :  { %v140_v13 = vpop.xlane.xlu0 %139 }
 0x171   :  { %v143_v14 = vmul.f32 0.015625, %v140_v13 }
 0x173   :  { %v145_v15 = vsub.f32 %v137_v11, %v143_v14  ;;  %v153_v21 = vmul.f32 %v143_v14, %v143_v14 }
 0x174   :  { %v142_v16 = vpop.xlane.xlu0 %141 }
 0x175   :  { %v144_v17 = vmul.f32 0.015625, %v142_v16  ;;  %v147_v18 = vmul.f32 %v145_v15, %v145_v15  ;;  %v155_v23 = vmul.f32 64.0, %v153_v21 }
 0x177   :  { %v146_v19 = vsub.f32 %v138_v12, %v144_v17  ;;  %149 = vadd.xlane.f32.xlu1 %v147_v18  ;;  %v154_v22 = vmul.f32 %v144_v17, %v144_v17 }
 0x179   :  { %v148_v20 = vmul.f32 %v146_v19, %v146_v19  ;;  %v156_v26 = vmul.f32 64.0, %v154_v22 }
 0x17b   :  { %151 = vadd.xlane.f32.xlu1 %v148_v20 }
 0x204   :  { %v150_v24 = vpop.xlane.xlu1 %149 }
 0x205   :  { %v157_v25 = vsub.f32 %v150_v24, %v155_v23 }
 0x207   :  { %v159_v27 = vmul.f32 0.015625, %v157_v25 }
 0x208   :  { %v152_v28 = vpop.xlane.xlu1 %151 }
 0x209   :  { %v161_v29 = vadd.f32 1e-05, %v159_v27  ;;  %v158_v30 = vsub.f32 %v152_v28, %v156_v26 }
 0x20b   :  { %244 = vrsqrt.f32 %v161_v29  ;;  %v160_v31 = vmul.f32 0.015625, %v158_v30 }
 0x20d   :  { %v162_v32 = vadd.f32 1e-05, %v160_v31 }
 0x20f   :  { %246 = vrsqrt.f32 %v162_v32 }
 0x215   :  { %v245_v34 = vpop.eup %244 }
 0x216   :  { %v172_v35 = vmul.f32 %v245_v34, %v214_v33 }
 0x218   :  { %v174_v37 = vmul.f32 %v172_v35, %v145_v15 }
 0x219   :  { %v247_v38 = vpop.eup %246 }
 0x21a   :  { %v173_v40 = vmul.f32 %v247_v38, %v214_v33  ;;  %v183_v41 = vadd.f32 %v215_v36, %v174_v37 }
 0x21c   :  { %v175_v42 = vmul.f32 %v173_v40, %v146_v19  ;;  %vm186_vm1 = vcmp.ge.f32.partialorder %v183_v41, 0.0  ;;  %v189_v43 = vmul.f32 %v188_v39, %v183_v41 }
 0x21e   :  { %v184_v44 = vadd.f32 %v215_v36, %v175_v42  ;;  %v191_v45 = vsel %vm186_vm1, %v183_v41, %v189_v43 }
 0x21f   :  { %193 = vst [vmem:[#allocation4] sm:$0xff] %v191_v45 }
 0x220   :  { %vm187_vm2 = vcmp.ge.f32.partialorder %v184_v44, 0.0  ;;  %v190_v46 = vmul.f32 %v188_v39, %v184_v44 }
 0x222   :  { %v192_v47 = vsel %vm187_vm2, %v184_v44, %v190_v46 }
 0x223   :  { %194 = vst [vmem:[#allocation4 + $0x8] sm:$0xff] %v192_v47 }
 0x224   :  { %259 = shalt.err (!%p256_p4)
}
 0x225   :  { %s260_s16 = scalar_lea.hbm %s358_s6, 256 }
 0x226   :  { %p261_p5 = scmp.ne.s32.totalorder %s358_s6, %s260_s16  ;;  %p264_p6 = scmp.lt.u32.totalorder %s260_s16, %s358_s6 }
 0x228   :  { %p266_p7 = pnand %p264_p6, %p261_p5 }
 0x22a   :  { %269 = shalt.err (!%p266_p7)
}
 0x22b   :  { %s273_s21 = smov 128   ;;  %s274_s22 = smov 8  }
 0x22c   :  { %206 = dma.vmem_to_hbm [thread:$0]  %s201_s15, 256, %s358_s6, [#allocation5], %s273_s21, %s273_s21, %s274_s22  }
 0x22d   :  { %270 = dma.done.wait [#allocation5], 256  }
 0x22e   :  { %271 = vsyncadd [#allocation5], 4294967040 }
 0x22f   :  { %210 = vsyncpa [#allocation5], 1 }

</bundles_post_ra>
